<compile_context>
chip_gen: v6e
topology: v6e:2x2x1
jax: 0.10.0
libtpu: 0.0.40
codegen_flags: <defaults>
</compile_context>

<pallas_src>
import math

import jax
import jax.numpy as jnp
from jax import lax
from jax.experimental import pallas as pl
from jax.experimental.pallas import tpu as pltpu


# --------------------------------------------------------------------------- #
# Hardware probing helpers (per-generation VMEM budget / dtype / core count).
# --------------------------------------------------------------------------- #
def _device_kind():
    try:
        return jax.devices()[0].device_kind.lower()
    except Exception:
        return ""


def _vmem_capacity_bytes():
    try:
        return int(pltpu.get_tpu_info().vmem_capacity_bytes)
    except Exception:
        return 64 << 20  # conservative (v7x-sized) fallback


def _default_compute_dtype():
    kind = _device_kind()
    # bf16 VPU/MXU on v6e and v7x; v5e's VPU has no bf16 ALU -> stay f32 there.
    if ("v6" in kind) or ("v7" in kind) or ("7x" in kind):
        return jnp.bfloat16
    return jnp.float32


def _has_two_tensorcores():
    kind = _device_kind()
    return ("v7" in kind) or ("7x" in kind)


# --------------------------------------------------------------------------- #
# Kernel
# --------------------------------------------------------------------------- #
def _make_kernel(m_chunk, compute_dtype):
    cd = compute_dtype

    def kernel(x_ref, y_ref, w1x_ref, w1y_ref, b1_ref, w2_ref, b2_ref,
               out_ref, ya_ref, hsum_ref):
        TB, N, DX = x_ref.shape
        _, M, DY = y_ref.shape
        H = w1x_ref.shape[1]

        # Flatten batch/set axes so the matmuls present TB*N / TB*M rows to the MXU.
        x = x_ref[...].reshape(TB * N, DX).astype(cd)
        y = y_ref[...].reshape(TB * M, DY).astype(cd)

        # pairs @ W1 = X @ W1x (per n) + Y @ W1y (per m): no pair tensor, no concat.
        xa = jnp.dot(x, w1x_ref[...].astype(cd),
                     preferred_element_type=jnp.float32)              # (TB*N, H) f32
        # Fold b1 into the Y projection once (saves a VALU add per TB*N*M*H element).
        ya = jnp.dot(y, w1y_ref[...].astype(cd),
                     preferred_element_type=jnp.float32) + b1_ref[...]  # (TB*M, H)

        xa4 = xa.astype(cd).reshape(TB, N, 1, H)
        ya_ref[...] = ya.astype(cd).reshape(TB, M, H)          # stage in VMEM scratch
        hsum_ref[...] = jnp.zeros_like(hsum_ref)               # f32 accumulator

        n_chunks = M // m_chunk

        def m_step(c, carry):
            ya_c = ya_ref[:, pl.ds(c * m_chunk, m_chunk), :]          # (TB, MC, H)
            h = jnp.maximum(xa4 + ya_c.reshape(TB, 1, m_chunk, H), 0.0)  # (TB,N,MC,H)
            # Sublane reduce over the chunk's M axis; accumulate in f32.
            hsum_ref[...] += jnp.sum(h.astype(jnp.float32), axis=2)
            return carry

        lax.fori_loop(0, n_chunks, m_step, 0, unroll=True)

        # Sum-pool hoisted in front of the 2nd Linear (exact identity):
        #   sum_m(relu(.) @ W2 + b2) = hsum @ W2 + M * b2
        hsum = hsum_ref[...].reshape(TB * N, H)
        z = (jnp.dot(hsum.astype(cd), w2_ref[...].astype(cd),
                     preferred_element_type=jnp.float32)
             + float(M) * b2_ref[...])                                 # (TB*N, DOUT)
        out_ref[...] = z.astype(out_ref.dtype)

    return kernel


# --------------------------------------------------------------------------- #
# Host-side wrapper
# --------------------------------------------------------------------------- #
def _pick_block_batch(B, N, M, DX, DY, H, DOUT, m_chunk, vmem_budget,
                      want_two_steps):
    """Largest batch tile that (a) divides B, (b) keeps the (TB*N, DOUT) output
    block 8-aligned, (c) fits the per-step VMEM budget; on 2-TC parts prefer
    >= 2 grid steps so both TensorCores get work."""
    def valid(tb):
        return B % tb == 0 and ((tb * N) % 8 == 0 or tb == B)

    # Rough per-batch-element VMEM bytes for one grid step (f32-conservative):
    # double-buffered X/Y/out blocks + xa + ya/hsum scratches + streamed h chunk.
    per_b = 4 * (2 * (N * DX + M * DY + N * DOUT)
                 + 2 * N * H + M * H + N * m_chunk * H)
    cap = max(1, vmem_budget // per_b)

    divisors = [d for d in range(1, B + 1) if valid(d)]   # always contains B
    fitting = [d for d in divisors if d <= cap] or divisors[:1]
    if want_two_steps and B >= 2:
        halved = [d for d in fitting if d <= B // 2]
        if halved:
            return max(halved)
    return max(fitting)


def make_params(key, dx, dy, hidden, dout):
    """net = Linear(dy+dx, hidden) -> ReLU -> Linear(hidden, dout), packed W1."""
    k1, k2, k3, k4 = jax.random.split(key, 4)
    w1 = jax.random.normal(k1, (dy + dx, hidden), jnp.float32) / math.sqrt(dy + dx)
    b1 = 0.01 * jax.random.normal(k2, (1, hidden), jnp.float32)
    w2 = jax.random.normal(k3, (hidden, dout), jnp.float32) / math.sqrt(hidden)
    b2 = 0.01 * jax.random.normal(k4, (1, dout), jnp.float32)
    return w1, b1, w2, b2


def relation_network(X, Y, params, *, block_batch=None, m_chunk=None,
                     compute_dtype=None):
    """Pallas forward for RelationNetwork (sum pool, no mask, equi=False)."""
    B, N, DX = X.shape
    _, M, DY = Y.shape
    w1, b1, w2, b2 = params
    H = w1.shape[1]
    DOUT = w2.shape[1]
    assert w1.shape[0] == DY + DX

    if compute_dtype is None:
        compute_dtype = _default_compute_dtype()

    # Split packed W1 on the host (in-kernel slices are not views and can copy).
    w1y = w1[:DY]
    w1x = w1[DY:]

    # Cast inputs / weights to the compute dtype on the host (halves input DMA
    # bytes on the bf16 path); biases stay f32, dots accumulate in f32.
    Xc = X.astype(compute_dtype)
    Yc = Y.astype(compute_dtype)
    w1xc = w1x.astype(compute_dtype)
    w1yc = w1y.astype(compute_dtype)
    w2c = w2.astype(compute_dtype)

    # M streaming chunk: 8 rows aligns with the sublane tile; must divide M.
    if m_chunk is None:
        m_chunk = M if M <= 8 else 8
        while M % m_chunk:
            m_chunk -= 1
    assert M % m_chunk == 0

    vmem_cap = _vmem_capacity_bytes()
    vmem_limit = int(vmem_cap * 3 // 4)          # raise the scoped-VMEM default
    vmem_budget = vmem_cap // 2                  # headroom for the tiling formula

    if block_batch is None:
        block_batch = _pick_block_batch(B, N, M, DX, DY, H, DOUT, m_chunk,
                                        vmem_budget,
                                        want_two_steps=_has_two_tensorcores())
    assert B % block_batch == 0
    TB = block_batch
    grid = (B // TB,)

    kernel = _make_kernel(m_chunk, compute_dtype)

    def whole(arr):
        nd = arr.ndim
        return pl.BlockSpec(arr.shape, lambda b, _nd=nd: (0,) * _nd)

    out_flat = pl.pallas_call(
        kernel,
        out_shape=jax.ShapeDtypeStruct((B * N, DOUT), jnp.float32),
        grid=grid,
        in_specs=[
            pl.BlockSpec((TB, N, DX), lambda b: (b, 0, 0)),
            pl.BlockSpec((TB, M, DY), lambda b: (b, 0, 0)),
            whole(w1xc), whole(w1yc), whole(b1), whole(w2c), whole(b2),
        ],
        out_specs=pl.BlockSpec((TB * N, DOUT), lambda b: (b, 0)),
        scratch_shapes=[
            pltpu.VMEM((TB, M, H), compute_dtype),   # ya (b1 folded), staged once
            pltpu.VMEM((TB, N, H), jnp.float32),     # hsum accumulator
        ],
        compiler_params=pltpu.CompilerParams(
            dimension_semantics=("parallel",),
            vmem_limit_bytes=vmem_limit,
        ),
    )(Xc, Yc, w1xc, w1yc, b1, w2c, b2)

    return out_flat.reshape(B, N, DOUT)


# --------------------------------------------------------------------------- #
# Pure-JAX reference: literal translation of the PyTorch forward (f32).
# --------------------------------------------------------------------------- #
def _ref(X, Y, params):
    w1, b1, w2, b2 = params
    B, N, DX = X.shape
    _, M, DY = Y.shape
    pairs = jnp.concatenate(
        [jnp.broadcast_to(Y[:, None, :, :], (B, N, M, DY)),
         jnp.broadcast_to(X[:, :, None, :], (B, N, M, DX))], axis=-1)
    h = jnp.maximum(jnp.dot(pairs, w1) + b1[0], 0.0)
    Z = jnp.dot(h, w2) + b2[0]
    return jnp.sum(Z, axis=2)                    # pool='sum' over dim=2


if __name__ == "__main__":
    key = jax.random.PRNGKey(0)
    kx, ky, kp = jax.random.split(key, 3)

    # Small shapes consistent with the module: batch=2, set sizes N=M=8,
    # per-element feature 16 (pair feature 32), hidden=32, output=32.
    B, N, M, DX, DY, HIDDEN, DOUT = 2, 8, 8, 16, 16, 32, 32
    X = jax.random.normal(kx, (B, N, DX), jnp.float32)
    Y = jax.random.normal(ky, (B, M, DY), jnp.float32)
    params = make_params(kp, DX, DY, HIDDEN, DOUT)

    ref = _ref(X, Y, params)

    # 1) f32 path: the restructuring is an exact identity -> tight tolerance.
    out_f32 = jax.block_until_ready(
        relation_network(X, Y, params, compute_dtype=jnp.float32))
    assert out_f32.shape == (B, N, DOUT)
    assert jnp.allclose(out_f32, ref, atol=1e-3, rtol=1e-3), \
        float(jnp.max(jnp.abs(out_f32 - ref)))

    # 2) auto path (bf16 on v6e/v7x, f32 on v5e) -> bf16-appropriate tolerance.
    out = jax.block_until_ready(relation_network(X, Y, params))
    assert out.shape == (B, N, DOUT)
    assert jnp.allclose(out, ref, atol=1.5e-1, rtol=5e-2), \
        float(jnp.max(jnp.abs(out - ref)))

    print("KERNEL_OK")
</pallas_src>

<mosaic_0001>
module attributes {stable_mosaic.version = 11 : i64} {
  func.func @kernel(%arg0: i32, %arg1: memref<2x8x16xf32, #tpu.memory_space<vmem>>, %arg2: memref<2x8x16xf32, #tpu.memory_space<vmem>>, %arg3: memref<16x32xf32, #tpu.memory_space<vmem>>, %arg4: memref<16x32xf32, #tpu.memory_space<vmem>>, %arg5: memref<1x32xf32, #tpu.memory_space<vmem>>, %arg6: memref<32x32xf32, #tpu.memory_space<vmem>>, %arg7: memref<1x32xf32, #tpu.memory_space<vmem>>, %arg8: memref<16x32xf32, #tpu.memory_space<vmem>>, %arg9: memref<2x8x32xf32, #tpu.memory_space<vmem>>, %arg10: memref<2x8x32xf32, #tpu.memory_space<vmem>>) attributes {dimension_semantics = [#tpu.dimension_semantics<parallel>], iteration_bounds = array<i64: 1>, scalar_prefetch = 0 : i64, scratch_operands = 2 : i64, tpu.core_type = #tpu.core_type<tc>, window_params = [{transform_indices = @transform_0, window_bounds = array<i64: 2, 8, 16>}, {transform_indices = @transform_1, window_bounds = array<i64: 2, 8, 16>}, {pipeline_mode = #tpu.pipeline_mode<synchronous>, transform_indices = @transform_2, window_bounds = array<i64: 16, 32>}, {pipeline_mode = #tpu.pipeline_mode<synchronous>, transform_indices = @transform_3, window_bounds = array<i64: 16, 32>}, {pipeline_mode = #tpu.pipeline_mode<synchronous>, transform_indices = @transform_4, window_bounds = array<i64: 1, 32>}, {pipeline_mode = #tpu.pipeline_mode<synchronous>, transform_indices = @transform_5, window_bounds = array<i64: 32, 32>}, {pipeline_mode = #tpu.pipeline_mode<synchronous>, transform_indices = @transform_6, window_bounds = array<i64: 1, 32>}, {transform_indices = @transform_7, window_bounds = array<i64: 16, 32>}]} {
    %c0 = arith.constant 0 : index
    %c0_0 = arith.constant 0 : index
    %c0_1 = arith.constant 0 : index
    %0 = vector.load %arg1[%c0, %c0_0, %c0_1] : memref<2x8x16xf32, #tpu.memory_space<vmem>>, vector<2x8x16xf32>
    %1 = vector.shape_cast %0 : vector<2x8x16xf32> to vector<16x16xf32>
    %c0_2 = arith.constant 0 : index
    %c0_3 = arith.constant 0 : index
    %c0_4 = arith.constant 0 : index
    %2 = vector.load %arg2[%c0_2, %c0_3, %c0_4] : memref<2x8x16xf32, #tpu.memory_space<vmem>>, vector<2x8x16xf32>
    %3 = vector.shape_cast %2 : vector<2x8x16xf32> to vector<16x16xf32>
    %c0_5 = arith.constant 0 : index
    %c0_6 = arith.constant 0 : index
    %4 = vector.load %arg3[%c0_5, %c0_6] : memref<16x32xf32, #tpu.memory_space<vmem>>, vector<16x32xf32>
    %cst = arith.constant dense<0.000000e+00> : vector<16x32xf32>
    %5 = tpu.matmul %1, %4, %cst {dimension_numbers = #tpu.dot_dimension_numbers<[1], [0], [0], [1], [0, 0, 1, 1], [], []>} : vector<16x16xf32>, vector<16x32xf32>, vector<16x32xf32> -> vector<16x32xf32>
    %c0_7 = arith.constant 0 : index
    %c0_8 = arith.constant 0 : index
    %6 = vector.load %arg4[%c0_7, %c0_8] : memref<16x32xf32, #tpu.memory_space<vmem>>, vector<16x32xf32>
    %cst_9 = arith.constant dense<0.000000e+00> : vector<16x32xf32>
    %7 = tpu.matmul %3, %6, %cst_9 {dimension_numbers = #tpu.dot_dimension_numbers<[1], [0], [0], [1], [0, 0, 1, 1], [], []>} : vector<16x16xf32>, vector<16x32xf32>, vector<16x32xf32> -> vector<16x32xf32>
    %c0_10 = arith.constant 0 : index
    %c0_11 = arith.constant 0 : index
    %8 = vector.load %arg5[%c0_10, %c0_11] : memref<1x32xf32, #tpu.memory_space<vmem>>, vector<1x32xf32>
    %9 = vector.broadcast %8 : vector<1x32xf32> to vector<16x32xf32>
    %10 = arith.addf %7, %9 : vector<16x32xf32>
    %11 = vector.shape_cast %5 : vector<16x32xf32> to vector<2x8x1x32xf32>
    %12 = vector.shape_cast %10 : vector<16x32xf32> to vector<2x8x32xf32>
    %c0_12 = arith.constant 0 : index
    %c0_13 = arith.constant 0 : index
    %c0_14 = arith.constant 0 : index
    %13 = vector.load %arg9[%c0_12, %c0_13, %c0_14] : memref<2x8x32xf32, #tpu.memory_space<vmem>>, vector<2x8x32xf32>
    tpu.vector_store %arg9[%c0_12, %c0_13, %c0_14], %12 {strides = array<i32>} : memref<2x8x32xf32, #tpu.memory_space<vmem>>, vector<2x8x32xf32>,
    %cst_15 = arith.constant 0.000000e+00 : f32
    %14 = vector.broadcast %cst_15 : f32 to vector<2x8x32xf32>
    %c0_16 = arith.constant 0 : index
    %c0_17 = arith.constant 0 : index
    %c0_18 = arith.constant 0 : index
    %15 = vector.load %arg10[%c0_16, %c0_17, %c0_18] : memref<2x8x32xf32, #tpu.memory_space<vmem>>, vector<2x8x32xf32>
    tpu.vector_store %arg10[%c0_16, %c0_17, %c0_18], %14 {strides = array<i32>} : memref<2x8x32xf32, #tpu.memory_space<vmem>>, vector<2x8x32xf32>,
    %c0_i32 = arith.constant 0 : i32
    %c8_i32 = arith.constant 8 : i32
    %16 = arith.muli %c0_i32, %c8_i32 : i32
    %c0_19 = arith.constant 0 : index
    %17 = arith.index_cast %16 : i32 to index
    %c0_20 = arith.constant 0 : index
    %18 = vector.load %arg9[%c0_19, %17, %c0_20] : memref<2x8x32xf32, #tpu.memory_space<vmem>>, vector<2x8x32xf32>
    %19 = vector.shape_cast %18 : vector<2x8x32xf32> to vector<2x1x8x32xf32>
    %20 = vector.broadcast %11 : vector<2x8x1x32xf32> to vector<2x8x8x32xf32>
    %21 = vector.broadcast %19 : vector<2x1x8x32xf32> to vector<2x8x8x32xf32>
    %22 = arith.addf %20, %21 : vector<2x8x8x32xf32>
    %cst_21 = arith.constant 0.000000e+00 : f32
    %23 = vector.broadcast %cst_21 : f32 to vector<2x8x8x32xf32>
    %24 = arith.maximumf %22, %23 : vector<2x8x8x32xf32>
    %c0_22 = arith.constant 0 : index
    %c0_23 = arith.constant 0 : index
    %c0_24 = arith.constant 0 : index
    %25 = vector.load %arg10[%c0_22, %c0_23, %c0_24] : memref<2x8x32xf32, #tpu.memory_space<vmem>>, vector<2x8x32xf32>
    %cst_25 = arith.constant dense<0.000000e+00> : vector<2x8x32xf32>
    %26 = vector.multi_reduction <add>, %24, %cst_25 [2] : vector<2x8x8x32xf32> to vector<2x8x32xf32>
    %27 = arith.addf %25, %26 : vector<2x8x32xf32>
    %c0_26 = arith.constant 0 : index
    %c0_27 = arith.constant 0 : index
    %c0_28 = arith.constant 0 : index
    %28 = vector.load %arg10[%c0_26, %c0_27, %c0_28] : memref<2x8x32xf32, #tpu.memory_space<vmem>>, vector<2x8x32xf32>
    tpu.vector_store %arg10[%c0_26, %c0_27, %c0_28], %27 {strides = array<i32>} : memref<2x8x32xf32, #tpu.memory_space<vmem>>, vector<2x8x32xf32>,
    %c1_i32 = arith.constant 1 : i32
    %c0_29 = arith.constant 0 : index
    %c0_30 = arith.constant 0 : index
    %c0_31 = arith.constant 0 : index
    %29 = vector.load %arg10[%c0_29, %c0_30, %c0_31] : memref<2x8x32xf32, #tpu.memory_space<vmem>>, vector<2x8x32xf32>
    %30 = vector.shape_cast %29 : vector<2x8x32xf32> to vector<16x32xf32>
    %c0_32 = arith.constant 0 : index
    %c0_33 = arith.constant 0 : index
    %31 = vector.load %arg6[%c0_32, %c0_33] : memref<32x32xf32, #tpu.memory_space<vmem>>, vector<32x32xf32>
    %cst_34 = arith.constant dense<0.000000e+00> : vector<16x32xf32>
    %32 = tpu.matmul %30, %31, %cst_34 {dimension_numbers = #tpu.dot_dimension_numbers<[1], [0], [0], [1], [0, 0, 1, 1], [], []>} : vector<16x32xf32>, vector<32x32xf32>, vector<16x32xf32> -> vector<16x32xf32>
    %c0_35 = arith.constant 0 : index
    %c0_36 = arith.constant 0 : index
    %33 = vector.load %arg7[%c0_35, %c0_36] : memref<1x32xf32, #tpu.memory_space<vmem>>, vector<1x32xf32>
    %cst_37 = arith.constant 8.000000e+00 : f32
    %34 = vector.broadcast %cst_37 : f32 to vector<1x32xf32>
    %35 = arith.mulf %34, %33 : vector<1x32xf32>
    %36 = vector.broadcast %35 : vector<1x32xf32> to vector<16x32xf32>
    %37 = arith.addf %32, %36 : vector<16x32xf32>
    %c0_38 = arith.constant 0 : index
    %c0_39 = arith.constant 0 : index
    %38 = vector.load %arg8[%c0_38, %c0_39] : memref<16x32xf32, #tpu.memory_space<vmem>>, vector<16x32xf32>
    tpu.vector_store %arg8[%c0_38, %c0_39], %37 {strides = array<i32>} : memref<16x32xf32, #tpu.memory_space<vmem>>, vector<16x32xf32>,
    return
  }
  func.func @transform_0(%arg0: i32) -> (i32, i32, i32) {
    %c0_i32 = arith.constant 0 : i32
    %c0_i32_0 = arith.constant 0 : i32
    %c0_i32_1 = arith.constant 0 : i32
    return %arg0, %c0_i32, %c0_i32_0 : i32, i32, i32
  }
  func.func @transform_1(%arg0: i32) -> (i32, i32, i32) {
    %c0_i32 = arith.constant 0 : i32
    %c0_i32_0 = arith.constant 0 : i32
    %c0_i32_1 = arith.constant 0 : i32
    return %arg0, %c0_i32, %c0_i32_0 : i32, i32, i32
  }
  func.func @transform_2(%arg0: i32) -> (i32, i32) {
    %c0_i32 = arith.constant 0 : i32
    %c0_i32_0 = arith.constant 0 : i32
    %c0_i32_1 = arith.constant 0 : i32
    return %c0_i32, %c0_i32_0 : i32, i32
  }
  func.func @transform_3(%arg0: i32) -> (i32, i32) {
    %c0_i32 = arith.constant 0 : i32
    %c0_i32_0 = arith.constant 0 : i32
    %c0_i32_1 = arith.constant 0 : i32
    return %c0_i32, %c0_i32_0 : i32, i32
  }
  func.func @transform_4(%arg0: i32) -> (i32, i32) {
    %c0_i32 = arith.constant 0 : i32
    %c0_i32_0 = arith.constant 0 : i32
    %c0_i32_1 = arith.constant 0 : i32
    return %c0_i32, %c0_i32_0 : i32, i32
  }
  func.func @transform_5(%arg0: i32) -> (i32, i32) {
    %c0_i32 = arith.constant 0 : i32
    %c0_i32_0 = arith.constant 0 : i32
    %c0_i32_1 = arith.constant 0 : i32
    return %c0_i32, %c0_i32_0 : i32, i32
  }
  func.func @transform_6(%arg0: i32) -> (i32, i32) {
    %c0_i32 = arith.constant 0 : i32
    %c0_i32_0 = arith.constant 0 : i32
    %c0_i32_1 = arith.constant 0 : i32
    return %c0_i32, %c0_i32_0 : i32, i32
  }
  func.func @transform_7(%arg0: i32) -> (i32, i32) {
    %c0_i32 = arith.constant 0 : i32
    %c0_i32_0 = arith.constant 0 : i32
    return %arg0, %c0_i32 : i32, i32
  }
}

</mosaic_0001>

<bundles_post_ra>
// kernel: tpu_custom_call.1
= control target key start
LH: loop header
LB: loop body
LE: loop exit
PB: predicated region body
PF: predicated region fallthrough
CT: control target
= control target key end

     0   :  { %12 = vsyncpa [#allocation5], 0  ;;  %s1156_s0 = inlined_call_operand.hbm [shape: f32[2,8,16], index: 0, kind: input, shape index: {}]   ;;  %s1157_s1 = inlined_call_operand.hbm [shape: f32[2,8,16], index: 1, kind: input, shape index: {}]   ;;  %s1158_s2 = inlined_call_operand.hbm [shape: f32[16,32], index: 2, kind: input, shape index: {}]   ;;  %s1159_s3 = inlined_call_operand.hbm [shape: f32[16,32], index: 3, kind: input, shape index: {}]   ;;  %s1160_s4 = inlined_call_operand.vmem [shape: f32[1,32], index: 4, kind: input, shape index: {}]   ;;  %s1161_s5 = inlined_call_operand.hbm [shape: f32[32,32], index: 5, kind: input, shape index: {}]   ;;  %s1162_s6 = inlined_call_operand.vmem [shape: f32[1,32], index: 6, kind: input, shape index: {}]   ;;  %s1163_s7 = inlined_call_operand.hbm [shape: f32[16,32], index: 7, kind: output, shape index: {}]  }
   0x1   :  { %13 = vsyncpa [#allocation8], 0 }
   0x2   :  { %14 = vsyncpa [#allocation11], 0 }
   0x3   :  { %15 = vsyncpa [#allocation6], 0  ;;  %s949_s24 = smov [#allocation7]   ;;  %s950_s26 = smov [#allocation10]  }
   0x4   :  { %s33_s25 = sshll.u32 %s949_s24, 4  ;;  %s57_s27 = sshll.u32 %s950_s26, 4  ;;  %s34_s25 = int_to_ptr.vmem [resolvable:$true] %s33_s25  ;;  %s58_s27 = int_to_ptr.vmem [resolvable:$true] %s57_s27 }
   0x5   :  { %s829_s28 = scalar_lea.vmem %s34_s25, 256  ;;  %p834_p1 = scmp.lt.s32.totalorder %s34_s25, %s34_s25 }
   0x6   :  { %p830_p0 = scmp.ne.s32.totalorder %s34_s25, %s829_s28  ;;  %p835_p2 = scmp.lt.s32.totalorder %s829_s28, %s829_s28 }
   0x8   :  { %p836_p3 = por %p835_p2, %p834_p1 }
   0xa   :  { %p837_p4 = pnand %p836_p3, %p830_p0 }
   0xc   :  { %840 = shalt.err (!%p837_p4)
}
   0xd   :  { %s951_s29 = smov 128   ;;  %s952_s30 = smov 8  }
   0xe   :  { %39 = dma.hbm_to_vmem [thread:$0]  %s1157_s1, 256, %s34_s25, [#allocation8], %s951_s29, %s951_s29, %s952_s30  }
   0xf   :  { %s849_s10 = scalar_lea.vmem %s58_s27, 256  ;;  %p854_p6 = scmp.lt.s32.totalorder %s58_s27, %s58_s27 }
  0x10   :  { %p850_p5 = scmp.ne.s32.totalorder %s58_s27, %s849_s10  ;;  %p855_p7 = scmp.lt.s32.totalorder %s849_s10, %s849_s10 }
  0x12   :  { %p856_p8 = por %p855_p7, %p854_p6 }
  0x14   :  { %p857_p9 = pnand %p856_p8, %p850_p5 }
  0x16   :  { %860 = shalt.err (!%p857_p9)
}
  0x17   :  { %63 = dma.hbm_to_vmem [thread:$0]  %s1159_s3, 256, %s58_s27, [#allocation11], %s951_s29, %s951_s29, %s952_s30  }
  0x18   :  { %s953_s13 = smov [#allocation4]   ;;  %s954_s15 = smov [#allocation9]  }
  0x19   :  { %s21_s14 = sshll.u32 %s953_s13, 4  ;;  %s45_s16 = sshll.u32 %s954_s15, 4  ;;  %s22_s14 = int_to_ptr.vmem [resolvable:$true] %s21_s14  ;;  %s46_s16 = int_to_ptr.vmem [resolvable:$true] %s45_s16 }
  0x1a   :  { %s869_s1 = scalar_lea.vmem %s22_s14, 256  ;;  %p874_p11 = scmp.lt.s32.totalorder %s22_s14, %s22_s14 }
  0x1b   :  { %p870_p10 = scmp.ne.s32.totalorder %s22_s14, %s869_s1  ;;  %p875_p12 = scmp.lt.s32.totalorder %s869_s1, %s869_s1 }
  0x1d   :  { %p876_p13 = por %p875_p12, %p874_p11 }
  0x1f   :  { %p877_p0 = pnand %p876_p13, %p870_p10 }
  0x21   :  { %880 = shalt.err (!%p877_p0)
}
  0x22   :  { %27 = dma.hbm_to_vmem [thread:$0]  %s1156_s0, 256, %s22_s14, [#allocation5], %s951_s29, %s951_s29, %s952_s30  }
  0x23   :  { %s889_s3 = scalar_lea.vmem %s46_s16, 256  ;;  %p894_p2 = scmp.lt.s32.totalorder %s46_s16, %s46_s16 }
  0x24   :  { %p890_p1 = scmp.ne.s32.totalorder %s46_s16, %s889_s3  ;;  %p895_p3 = scmp.lt.s32.totalorder %s889_s3, %s889_s3 }
  0x26   :  { %p896_p4 = por %p895_p3, %p894_p2 }
  0x28   :  { %p897_p5 = pnand %p896_p4, %p890_p1 }
  0x2a   :  { %900 = shalt.err (!%p897_p5)
}
  0x2b   :  { %51 = dma.hbm_to_vmem [thread:$0]  %s1158_s2, 256, %s46_s16, [#allocation8], %s951_s29, %s951_s29, %s952_s30  }
  0x2c   :  { %s955_s21 = smov [#allocation12]  }
  0x2d   :  { %s71_s22 = sshll.u32 %s955_s21, 4  ;;  %s72_s22 = int_to_ptr.vmem [resolvable:$true] %s71_s22 }
  0x2e   :  { %s909_s23 = scalar_lea.vmem %s72_s22, 512  ;;  %p914_p7 = scmp.lt.s32.totalorder %s72_s22, %s72_s22 }
  0x2f   :  { %p910_p6 = scmp.ne.s32.totalorder %s72_s22, %s909_s23  ;;  %p915_p8 = scmp.lt.s32.totalorder %s909_s23, %s909_s23 }
  0x31   :  { %p916_p9 = por %p915_p8, %p914_p7 }
  0x33   :  { %p917_p10 = pnand %p916_p9, %p910_p6 }
  0x35   :  { %920 = shalt.err (!%p917_p10)
}
  0x36   :  { %77 = dma.hbm_to_vmem [thread:$0]  %s1161_s5, 512, %s72_s22, [#allocation11], %s951_s29, %s951_s29, %s952_s30  }
  0x37   :  { %941 = dma.done.wait [#allocation5], 256  }
  0x38   :  { %942 = vsyncadd [#allocation5], 4294967040 }
  0x39   :  { %943 = dma.done.wait [#allocation8], 512  }
  0x3a   :  { %944 = vsyncadd [#allocation8], 4294966784 }
  0x3b   :  { %945 = dma.done.wait [#allocation11], 768  }
  0x3c   :  { %946 = vsyncadd [#allocation11], 4294966528  ;;  %vm101_vm0 = vcmask 130048   ;;  %v100_v0 = vld [vmem:[#allocation9 + $0x8] sm:$0xff]  ;;  %v99_v1 = vld [vmem:[#allocation9] sm:$0xff]  ;;  %vm373_vm1 = vcmask 261120   ;;  %v279_v15 = vlaneseq }
  0x3d   :  { %v95_v2 = vld [vmem:[#allocation4] sm:$0xff]  ;;  %786 = vmatprep.subr.mxu1 %v100_v0  ;;  %v96_v3 = vld [vmem:[#allocation4 + $0x8] sm:$0xff]  ;;  %v184_v4 = vld [vmem:[#allocation10 + $0x8] sm:$0xff]  ;;  %v956_v10 = vmov 0.0   ;;  %v957_v13 = vmov 1966171168  }
  0x3e   :  { %790 = vmatprep.mubr.msk.f32.mxu1 %vm101_vm0, %v95_v2  ;;  %787 = vmatpush3.msra.mxu1 %v100_v0  ;;  %v97_v5 = vld [vmem:[#allocation7] sm:$0xff]  ;;  %v98_v7 = vld [vmem:[#allocation7 + $0x8] sm:$0xff]  ;;  %376 = vst.msk [vmem:[#allocation3] sm:$0xff] %vm373_vm1, %v956_v10  ;;  %377 = vst.msk [vmem:[#allocation3 + $0x8] sm:$0xff] %vm373_vm1, %v956_v10  ;;  %v277_v14 = vunpack.c.l.s4 %v957_v13  ;;  %v280_v17 = vshrl.u32 %v279_v15, 7  ;;  %vm622_vm2 = vcmask 1041409  }
  0x3f   :  { %788 = vmatprep.subr.mxu1 %v99_v1  ;;  %v183_v6 = vld [vmem:[#allocation10] sm:$0xff]  ;;  %v654_v8 = vld [vmem:[#allocation12 + $0x18] sm:$0xff]  ;;  %v652_v11 = vld [vmem:[#allocation12 + $0x8] sm:$0xff]  ;;  %vm624_vm3 = vcmask 1042434   ;;  %vm626_vm4 = vcmask 1043459   ;;  %vm628_vm5 = vcmask 1044484  }
  0x40   :  { %789 = vmatpush3.msra.mxu1 %v99_v1  ;;  %v653_v9 = vld [vmem:[#allocation12 + $0x10] sm:$0xff]  ;;  %800 = vmatprep.subr.mxu0 %v654_v8  ;;  %v651_v12 = vld [vmem:[#allocation12] sm:$0xff]  ;;  %v278_v16 = vunpack.c.0.s8 %v277_v14  ;;  %v1042_v43 = vsub.s32 0, %v280_v17  ;;  %vm630_vm6 = vcmask 1045509   ;;  %vm632_vm7 = vcmask 1046534   ;;  %s958_s26 = smov [#allocation13]  }
  0x41   :  { %791 = vmatmul.mubr.msk.f32.vlgmr.msra.gmra.mxu1 %vm101_vm0, %v96_v3  ;;  %793 = vmatprep.subr.mxu1 %v184_v4  ;;  %v767_v31 = vld [vmem:[%s1160_s4] ss:$0 sm:$0xff]  ;;  %vm634_vm8 = vcmask 1047559   ;;  %s751_s27 = sshll.u32 %s958_s26, 4  ;;  %s752_s27 = int_to_ptr.vmem [resolvable:$true] %s751_s27 }
  0x42   :  { %794 = vmatpush3.msra.mxu1 %v184_v4  ;;  %797 = vmatprep.mubr.msk.f32.mxu1 %vm101_vm0, %v97_v5  ;;  %v281_v18 = vsub.s32 %v278_v16, %v280_v17  ;;  %s921_s28 = scalar_lea.vmem %s752_s27, 256  ;;  %p926_p12 = scmp.lt.s32.totalorder %s752_s27, %s752_s27 }
  0x43   :  { %795 = vmatprep.subr.mxu1 %v183_v6  ;;  %801 = vmatpush3.msra.mxu0 %v654_v8  ;;  %p922_p11 = scmp.ne.s32.totalorder %s752_s27, %s921_s28  ;;  %p927_p13 = scmp.lt.s32.totalorder %s921_s28, %s921_s28 }
  0x44   :  { %796 = vmatpush3.msra.mxu1 %v183_v6  ;;  %802 = vmatprep.subr.mxu0 %v653_v9 }
  0x45   :  { %798 = vmatmul.mubr.msk.f32.vlgmr.msra.gmra.mxu1 %vm101_vm0, %v98_v7  ;;  %803 = vmatpush3.msra.mxu0 %v653_v9  ;;  %p928_p0 = por %p927_p13, %p926_p12 }
  0x46   :  { %804 = vmatprep.subr.mxu0 %v652_v11 }
  0x47   :  { %805 = vmatpush3.msra.mxu0 %v652_v11  ;;  %p929_p1 = pnand %p928_p0, %p922_p11 }
  0x48   :  { %806 = vmatprep.subr.mxu0 %v651_v12 }
  0x49   :  { %807 = vmatpush3.msra.mxu0 %v651_v12 }
 0x101   :  { %v792_v19 = vpop.f32.mrf.mxu1 }
 0x102   :  { %v324_v20 = vcombine.high %v792_v19, %v792_v19  ;;  %v331_v21 = vrot.slane %v792_v19, %v281_v18 }
 0x103   :  { %v174_v22 = vpop.f32.mrf.mxu1 }
 0x104   :  { %v338_v23 = vrot.slane %v324_v20, %v281_v18  ;;  %v275_v24 = vcombine.high %v174_v22, %v174_v22  ;;  %v282_v25 = vrot.slane %v174_v22, %v281_v18  ;;  %v339_v26 = vcombine.high %v331_v21, %v331_v21 }
 0x105   :  { %v799_v28 = vpop.f32.mrf.mxu1  ;;  %v347_v32 = vrot.slane %v331_v21, %v281_v18 }
 0x106   :  { %v340_v27 = vcombine.high %v338_v23, %v338_v23  ;;  %v289_v29 = vrot.slane %v275_v24, %v281_v18  ;;  %v290_v30 = vcombine.high %v282_v25, %v282_v25  ;;  %v354_v33 = vrot.slane %v338_v23, %v281_v18 }
 0x107   :  { %v361_v34 = vrot.slane %v339_v26, %v281_v18  ;;  %v264_v36 = vpop.f32.mrf.mxu1  ;;  %v270_v38 = vadd.f32 %v799_v28, %v767_v31  ;;  %v298_v39 = vrot.slane %v282_v25, %v281_v18  ;;  %v369_v42 = vcombine.high %v347_v32, %v347_v32 }
 0x108   :  { %v368_v35 = vrot.slane %v340_v27, %v281_v18  ;;  %v291_v37 = vcombine.high %v289_v29, %v289_v29  ;;  %v1038_v40 = vrot.slane %v289_v29, %v281_v18  ;;  %v1040_v41 = vrot.slane %v290_v30, %v281_v18 }
 0x109   :  { %375 = vst.msk [vmem:[#allocation2 + $0x8] sm:$0xff] %vm373_vm1, %v270_v38  ;;  %v265_v44 = vadd.f32 %v767_v31, %v264_v36  ;;  %v370_v45 = vcombine.high %v354_v33, %v354_v33  ;;  %v371_v46 = vcombine.high %v361_v34, %v361_v34  ;;  %v320_v49 = vcombine.high %v298_v39, %v298_v39 }
 0x10a   :  { %v372_v47 = vcombine.high %v368_v35, %v368_v35  ;;  %v1045_v48 = vrot.slane %v291_v37, %v281_v18  ;;  %v321_v50 = vcombine.high %v1038_v40, %v1038_v40  ;;  %v322_v51 = vcombine.high %v1040_v41, %v1040_v41 }
 0x10b   :  { %374 = vst.msk [vmem:[#allocation2] sm:$0xff] %vm373_vm1, %v265_v44  ;;  %v415_v52 = vrot.slane %v347_v32, %v1042_v43  ;;  %v419_v53 = vrot.slane %v361_v34, %v1042_v43  ;;  %v423_v54 = vrot.slane %v369_v42, %v1042_v43  ;;  %v431_v55 = vrot.slane %v354_v33, %v1042_v43 }
 0x10c   :  { %v427_v56 = vrot.slane %v371_v46, %v1042_v43  ;;  %v435_v57 = vrot.slane %v368_v35, %v1042_v43  ;;  %v439_v58 = vrot.slane %v370_v45, %v1042_v43  ;;  %v443_v59 = vrot.slane %v372_v47, %v1042_v43 }
 0x10d   :  { %v323_v60 = vcombine.high %v1045_v48, %v1045_v48  ;;  %v383_v61 = vrot.slane %v298_v39, %v1042_v43  ;;  %v387_v62 = vrot.slane %v1040_v41, %v1042_v43  ;;  %v399_v63 = vrot.slane %v1038_v40, %v1042_v43 }
 0x10e   :  { %v391_v0 = vrot.slane %v320_v49, %v1042_v43  ;;  %v395_v1 = vrot.slane %v322_v51, %v1042_v43  ;;  %v403_v2 = vrot.slane %v1045_v48, %v1042_v43  ;;  %v407_v3 = vrot.slane %v321_v50, %v1042_v43 }
 0x10f   :  { %v411_v17 = vrot.slane %v323_v60, %v1042_v43 }
 0x110   :  { %v379_v4 = vld [vmem:[#allocation2 + $0x8] sm:$0xff] }
 0x111   :  { %v468_v5 = vadd.f32 %v415_v52, %v379_v4  ;;  %v469_v6 = vadd.f32 %v419_v53, %v379_v4  ;;  %v470_v7 = vadd.f32 %v423_v54, %v379_v4  ;;  %v471_v8 = vadd.f32 %v427_v56, %v379_v4 }
 0x112   :  { %v472_v9 = vadd.f32 %v431_v55, %v379_v4  ;;  %v473_v10 = vadd.f32 %v435_v57, %v379_v4  ;;  %v1072_v11 = vadd.f32 %v439_v58, %v379_v4  ;;  %v1074_v12 = vadd.f32 %v443_v59, %v379_v4  ;;  %v378_v21 = vld [vmem:[#allocation2] sm:$0xff] }
 0x113   :  { %v484_v13 = vmax.f32 %v468_v5, 0.0  ;;  %v485_v14 = vmax.f32 %v469_v6, 0.0  ;;  %v486_v15 = vmax.f32 %v470_v7, 0.0  ;;  %v487_v16 = vmax.f32 %v471_v8, 0.0 }
 0x114   :  { %v488_v18 = vmax.f32 %v472_v9, 0.0  ;;  %v489_v19 = vmax.f32 %v473_v10, 0.0  ;;  %v490_v20 = vmax.f32 %v1072_v11, 0.0  ;;  %v491_v30 = vmax.f32 %v1074_v12, 0.0 }
 0x115   :  { %v550_v22 = vsel %vm373_vm1, %v484_v13, 0.0  ;;  %v557_v23 = vsel %vm373_vm1, %v485_v14, 0.0  ;;  %v564_v24 = vsel %vm373_vm1, %v486_v15, 0.0  ;;  %v571_v25 = vsel %vm373_vm1, %v487_v16, 0.0 }
 0x116   :  { %v551_v26 = vrot.slane %v550_v22, 4  ;;  %v558_v27 = vrot.slane %v557_v23, 4  ;;  %v565_v28 = vrot.slane %v564_v24, 4  ;;  %v572_v29 = vrot.slane %v571_v25, 4 }
 0x117   :  { %v578_v31 = vsel %vm373_vm1, %v488_v18, 0.0  ;;  %v585_v32 = vsel %vm373_vm1, %v489_v19, 0.0  ;;  %v460_v33 = vadd.f32 %v383_v61, %v378_v21  ;;  %v461_v40 = vadd.f32 %v387_v62, %v378_v21 }
 0x118   :  { %v552_v34 = vadd.f32 %v551_v26, %v550_v22  ;;  %v559_v35 = vadd.f32 %v558_v27, %v557_v23  ;;  %v566_v36 = vadd.f32 %v565_v28, %v564_v24  ;;  %v573_v37 = vadd.f32 %v572_v29, %v571_v25 }
 0x119   :  { %v579_v38 = vrot.slane %v578_v31, 4  ;;  %v586_v39 = vrot.slane %v585_v32, 4  ;;  %v462_v41 = vadd.f32 %v391_v0, %v378_v21  ;;  %v463_v48 = vadd.f32 %v395_v1, %v378_v21 }
 0x11a   :  { %v553_v42 = vrot.slane %v552_v34, 2  ;;  %v560_v44 = vrot.slane %v559_v35, 2  ;;  %v567_v45 = vrot.slane %v566_v36, 2  ;;  %v574_v46 = vrot.slane %v573_v37, 2 }
 0x11b   :  { %v1085_v47 = vadd.f32 %v579_v38, %v578_v31  ;;  %v464_v49 = vadd.f32 %v399_v63, %v378_v21  ;;  %v465_v50 = vadd.f32 %v403_v2, %v378_v21  ;;  %v1091_v54 = vadd.f32 %v586_v39, %v585_v32 }
 0x11c   :  { %v554_v51 = vadd.f32 %v553_v42, %v552_v34  ;;  %v1087_v52 = vadd.f32 %v560_v44, %v559_v35  ;;  %v1089_v53 = vadd.f32 %v567_v45, %v566_v36  ;;  %v1093_v55 = vadd.f32 %v574_v46, %v573_v37 }
 0x11d   :  { %v466_v56 = vadd.f32 %v407_v3, %v378_v21  ;;  %v476_v57 = vmax.f32 %v460_v33, 0.0  ;;  %v477_v58 = vmax.f32 %v461_v40, 0.0  ;;  %v581_v61 = vrot.slane %v1085_v47, 2 }
 0x11e   :  { %v555_v59 = vrot.slane %v554_v51, 1  ;;  %v562_v60 = vrot.slane %v1087_v52, 1  ;;  %v478_v62 = vmax.f32 %v462_v41, 0.0  ;;  %v569_v63 = vrot.slane %v1089_v53, 1 }
 0x11f   :  { %v479_v0 = vmax.f32 %v463_v48, 0.0  ;;  %v480_v1 = vmax.f32 %v464_v49, 0.0  ;;  %v481_v2 = vmax.f32 %v465_v50, 0.0  ;;  %v482_v5 = vmax.f32 %v466_v56, 0.0 }
 0x120   :  { %v1098_v4 = vadd.f32 %v555_v59, %v554_v51  ;;  %v494_v6 = vsel %vm373_vm1, %v476_v57, 0.0  ;;  %v501_v3 = vsel %vm373_vm1, %v477_v58, 0.0  ;;  %v508_v9 = vsel %vm373_vm1, %v478_v62, 0.0 }
 0x121   :  { %v495_v7 = vrot.slane %v494_v6, 4  ;;  %v502_v8 = vrot.slane %v501_v3, 4  ;;  %v515_v10 = vsel %vm373_vm1, %v479_v0, 0.0  ;;  %v509_v13 = vrot.slane %v508_v9, 4 }
 0x122   :  { %v516_v14 = vrot.slane %v515_v10, 4  ;;  %v522_v15 = vsel %vm373_vm1, %v480_v1, 0.0  ;;  %v467_v16 = vadd.f32 %v411_v17, %v378_v21  ;;  %v529_v23 = vsel %vm373_vm1, %v481_v2, 0.0 }
 0x123   :  { %v496_v18 = vadd.f32 %v495_v7, %v494_v6  ;;  %v503_v19 = vadd.f32 %v502_v8, %v501_v3  ;;  %v523_v22 = vrot.slane %v522_v15, 4  ;;  %v510_v24 = vadd.f32 %v509_v13, %v508_v9 }
 0x124   :  { %v517_v25 = vadd.f32 %v516_v14, %v515_v10  ;;  %v483_v26 = vmax.f32 %v467_v16, 0.0  ;;  %v530_v27 = vrot.slane %v529_v23, 4  ;;  %v536_v32 = vsel %vm373_vm1, %v482_v5, 0.0 }
 0x125   :  { %v497_v28 = vrot.slane %v496_v18, 2  ;;  %v504_v29 = vrot.slane %v503_v19, 2  ;;  %v524_v31 = vadd.f32 %v523_v22, %v522_v15  ;;  %v511_v33 = vrot.slane %v510_v24, 2 }
 0x126   :  { %v518_v34 = vrot.slane %v517_v25, 2  ;;  %v531_v35 = vadd.f32 %v530_v27, %v529_v23  ;;  %v537_v17 = vrot.slane %v536_v32, 4  ;;  %v543_v38 = vsel %vm373_vm1, %v483_v26, 0.0 }
 0x127   :  { %v498_v21 = vadd.f32 %v497_v28, %v496_v18  ;;  %v505_v36 = vadd.f32 %v504_v29, %v503_v19  ;;  %v525_v37 = vrot.slane %v524_v31, 2  ;;  %v512_v39 = vadd.f32 %v511_v33, %v510_v24 }
 0x128   :  { %v519_v40 = vadd.f32 %v518_v34, %v517_v25  ;;  %v532_v41 = vrot.slane %v531_v35, 2  ;;  %v538_v42 = vadd.f32 %v537_v17, %v536_v32  ;;  %v544_v48 = vrot.slane %v543_v38, 4 }
 0x129   :  { %v499_v44 = vrot.slane %v498_v21, 1  ;;  %v506_v45 = vrot.slane %v505_v36, 1  ;;  %v526_v46 = vadd.f32 %v525_v37, %v524_v31  ;;  %v513_v49 = vrot.slane %v512_v39, 1 }
 0x12a   :  { %v520_v50 = vrot.slane %v519_v40, 1  ;;  %v533_v51 = vadd.f32 %v532_v41, %v531_v35  ;;  %v539_v56 = vrot.slane %v538_v42, 2  ;;  %v545_v62 = vadd.f32 %v544_v48, %v543_v38 }
 0x12b   :  { %v500_v57 = vadd.f32 %v499_v44, %v498_v21  ;;  %v507_v58 = vadd.f32 %v506_v45, %v505_v36  ;;  %v527_v59 = vrot.slane %v526_v46, 1  ;;  %v563_v0 = vadd.f32 %v562_v60, %v1087_v52 }
 0x12c   :  { %v514_v1 = vadd.f32 %v513_v49, %v512_v39  ;;  %v534_v2 = vrot.slane %v533_v51, 1  ;;  %v540_v5 = vadd.f32 %v539_v56, %v538_v42  ;;  %v521_v6 = vadd.f32 %v520_v50, %v519_v40  ;;  %v493_v42 = vld [vmem:[#allocation3 + $0x8] sm:$0xff] }
 0x12d   :  { %v528_v3 = vadd.f32 %v527_v59, %v526_v46  ;;  %v546_v7 = vrot.slane %v545_v62, 2  ;;  %v623_v8 = vsel %vm622_vm2, %v507_v58, %v500_v57  ;;  %v576_v14 = vrot.slane %v1093_v55, 1 }
 0x12e   :  { %v535_v9 = vadd.f32 %v534_v2, %v533_v51  ;;  %v541_v10 = vrot.slane %v540_v5, 1  ;;  %v625_v13 = vsel %vm624_vm3, %v514_v1, %v623_v8  ;;  %v582_v52 = vadd.f32 %v581_v61, %v1085_v47  ;;  %v655_v51 = vld [vmem:[%s1162_s6] sm:$0x1] }
 0x12f   :  { %v547_v15 = vadd.f32 %v546_v7, %v545_v62  ;;  %v627_v16 = vsel %vm626_vm4, %v521_v6, %v625_v13  ;;  %v588_v60 = vrot.slane %v1091_v54, 2  ;;  %v570_v22 = vadd.f32 %v569_v63, %v1089_v53  ;;  %v492_v63 = vld [vmem:[#allocation3] sm:$0xff] }
 0x130   :  { %v542_v18 = vadd.f32 %v541_v10, %v540_v5  ;;  %v629_v19 = vsel %vm628_vm5, %v528_v3, %v627_v16  ;;  %v592_v23 = vsel %vm373_vm1, %v490_v20, 0.0  ;;  %v583_v26 = vrot.slane %v582_v52, 1 }
 0x131   :  { %v548_v24 = vrot.slane %v547_v15, 1  ;;  %v631_v25 = vsel %vm630_vm6, %v535_v9, %v629_v19  ;;  %v589_v27 = vadd.f32 %v588_v60, %v1091_v54  ;;  %v593_v61 = vrot.slane %v592_v23, 4 }
 0x132   :  { %v633_v47 = vsel %vm632_vm7, %v542_v18, %v631_v25  ;;  %v599_v28 = vsel %vm373_vm1, %v491_v30, 0.0  ;;  %v636_v53 = vsel %vm622_vm2, %v563_v0, %v1098_v4  ;;  %v577_v20 = vadd.f32 %v576_v14, %v1093_v55 }
 0x133   :  { %v549_v11 = vadd.f32 %v548_v24, %v547_v15  ;;  %v600_v29 = vrot.slane %v599_v28, 4  ;;  %v594_v31 = vadd.f32 %v593_v61, %v592_v23  ;;  %v637_v32 = vsel %vm624_vm3, %v570_v22, %v636_v53 }
 0x134   :  { %v590_v33 = vrot.slane %v589_v27, 1  ;;  %v638_v12 = vsel %vm626_vm4, %v577_v20, %v637_v32  ;;  %v584_v30 = vadd.f32 %v583_v26, %v582_v52  ;;  %v656_v56 = vmul.f32 8.0, %v655_v51 }
 0x135   :  { %v635_v54 = vsel %vm634_vm8, %v549_v11, %v633_v47  ;;  %v601_v34 = vadd.f32 %v600_v29, %v599_v28  ;;  %v595_v17 = vrot.slane %v594_v31, 2 }
 0x136   :  { %v645_v35 = vadd.f32 %v635_v54, %v492_v63  ;;  %v639_v55 = vsel %vm628_vm5, %v584_v30, %v638_v12  ;;  %v591_v36 = vadd.f32 %v590_v33, %v589_v27  ;;  %v661_v57 = vrot.slane %v656_v56, %v1042_v43 }
 0x137   :  { %v602_v21 = vrot.slane %v601_v34, 2  ;;  %v596_v4 = vadd.f32 %v595_v17, %v594_v31 }
 0x138   :  { %647 = vst.msk [vmem:[#allocation3] sm:$0xff] %vm373_vm1, %v645_v35  ;;  %v640_v40 = vsel %vm630_vm6, %v591_v36, %v639_v55 }
 0x139   :  { %v603_v37 = vadd.f32 %v602_v21, %v601_v34  ;;  %v597_v38 = vrot.slane %v596_v4, 1 }
 0x13b   :  { %v604_v39 = vrot.slane %v603_v37, 1  ;;  %v598_v41 = vadd.f32 %v597_v38, %v596_v4 }
 0x13d   :  { %v605_v44 = vadd.f32 %v604_v39, %v603_v37  ;;  %v641_v45 = vsel %vm632_vm7, %v598_v41, %v640_v40 }
 0x13f   :  { %v649_v46 = vld [vmem:[#allocation3] sm:$0xff]  ;;  %v642_v48 = vsel %vm634_vm8, %v605_v44, %v641_v45 }
 0x140   :  { %808 = vmatprep.mubr.msk.f32.mxu0 %vm373_vm1, %v649_v46  ;;  %v646_v49 = vadd.f32 %v642_v48, %v493_v42 }
 0x142   :  { %648 = vst.msk [vmem:[#allocation3 + $0x8] sm:$0xff] %vm373_vm1, %v646_v49 }
 0x149   :  { %v650_v50 = vld [vmem:[#allocation3 + $0x8] sm:$0xff] }
 0x14a   :  { %809 = vmatmul.mubr.msk.f32.vlgmr.msra.gmra.mxu0 %vm373_vm1, %v650_v50 }
 0x20a   :  { %v810_v58 = vpop.f32.mrf.mxu0 }
 0x20b   :  { %v741_v59 = vadd.f32 %v810_v58, %v661_v57 }
 0x20c   :  { %v735_v62 = vpop.f32.mrf.mxu0 }
 0x20d   :  { %745 = vst.msk [vmem:[#allocation13 + $0x8] sm:$0xff] %vm373_vm1, %v741_v59  ;;  %v736_v0 = vadd.f32 %v735_v62, %v661_v57 }
 0x20f   :  { %744 = vst.msk [vmem:[#allocation13] sm:$0xff] %vm373_vm1, %v736_v0 }
 0x210   :  { %932 = shalt.err (!%p929_p1)
}
 0x211   :  { %757 = dma.vmem_to_hbm [thread:$0]  %s752_s27, 256, %s1163_s7, [#allocation6], %s951_s29, %s951_s29, %s952_s30  }
 0x212   :  { %947 = dma.done.wait [#allocation6], 256  }
 0x213   :  { %948 = vsyncadd [#allocation6], 4294967040 }
 0x214   :  { %761 = vsyncpa [#allocation5], 1 }
 0x215   :  { %762 = vsyncpa [#allocation8], 1 }
 0x216   :  { %763 = vsyncpa [#allocation11], 1 }
 0x217   :  { %764 = vsyncpa [#allocation6], 1 }

</bundles_post_ra>
